<compile_context>
chip_gen: v7x
topology: tpu7x:2x2x1
jax: 0.10.0
libtpu: 0.0.40
codegen_flags: <defaults>
</compile_context>

<pallas_src>
import math

import jax
import jax.numpy as jnp
import numpy as np
from jax.experimental import pallas as pl
from jax.experimental.pallas import tpu as pltpu

LEAKY_SLOPE = 0.2            # nn.LeakyReLU(0.2)
EPS = 1e-5                   # nn.InstanceNorm2d default eps
INV_SQRT2 = 1.0 / math.sqrt(2.0)


# ----------------------------- in-kernel helpers ----------------------------

def _leaky_relu(x):
    return jnp.where(x >= 0.0, x, LEAKY_SLOPE * x)


def _inorm_stats_2d(x):
    # x: (C, HW) f32 -> per-channel (mean, rsqrt(var+eps)); biased variance,
    # clamped against cancellation in E[x^2] - mean^2.
    m = jnp.mean(x, axis=-1, keepdims=True)
    ex2 = jnp.mean(x * x, axis=-1, keepdims=True)
    var = jnp.maximum(ex2 - m * m, 0.0)
    return m, jax.lax.rsqrt(var + EPS)


def _inorm_stats_3d(x, n_elems):
    # x: (4, C, HWq) phase-split f32.  Stats over phases AND positions
    # (== stats over the original full-resolution H*W map).
    s1 = jnp.sum(jnp.sum(x, axis=0), axis=-1, keepdims=True)       # (C, 1)
    s2 = jnp.sum(jnp.sum(x * x, axis=0), axis=-1, keepdims=True)   # (C, 1)
    m = s1 / n_elems
    var = jnp.maximum(s2 / n_elems - m * m, 0.0)
    return m, jax.lax.rsqrt(var + EPS)


def _stack_taps(h, masks_ref, H, W):
    """h: (C, HW) -> (9*C, HW): row block t holds the (dy,dx)-shifted, edge-
    masked (zero padded) copy of h.  Feeds one (Cout, 9C) @ (9C, HW) matmul."""
    HW = H * W
    pieces = []
    for t in range(9):
        dy, dx = t // 3 - 1, t % 3 - 1
        d = dy * W + dx
        if d == 0:
            pieces.append(h)
        else:
            s = pltpu.roll(h, (-d) % HW, axis=1)       # s[p] = h[p + d]
            pieces.append(s * masks_ref[t])            # zero out wrapped edges
    return jnp.concatenate(pieces, axis=0)


def _stack_pooled_taps(h_ph, masks_ref, Hq, Wq):
    """h_ph: list of 4 (C, HWq) phase maps of the FULL-RES activation
    (phase p = 2a+b holds h[2i+a, 2j+b]).  Returns (9*C, HWq) where row block t
    is the SUM over the 2x2 pooling window of the (dy,dx)-shifted activation
    (the 1/4 is folded into the conv1 weights), so that
        W1_stacked @ result == avg_pool2d(conv1(h), 2)."""
    HWq = Hq * Wq
    pieces = []
    for t in range(9):
        dy, dx = t // 3 - 1, t % 3 - 1
        acc = None
        for a in (0, 1):
            for b in (0, 1):
                r, c = a + dy, b + dx
                ap, bp = r % 2, c % 2                   # source phase parity
                si, sj = (r - ap) // 2, (c - bp) // 2   # shift on half-res grid
                src = h_ph[2 * ap + bp]
                d = si * Wq + sj
                if d != 0:
                    src = pltpu.roll(src, (-d) % HWq, axis=1)
                if si != 0 or sj != 0:
                    src = src * masks_ref[(si + 1) * 3 + (sj + 1)]
                acc = src if acc is None else acc + src
        pieces.append(acc)
    return jnp.concatenate(pieces, axis=0)


# ------------------------------- Pallas kernel -------------------------------

def make_resblk_kernel(do_norm, learned_sc, downsample, H, W, mxu_dtype):
    """H, W are the OUTPUT spatial dims (post-pool when downsample=True)."""
    HW = H * W

    def kernel(x_ref, n1w_ref, n1b_ref, w1_ref, b1_ref,
               n2w_ref, n2b_ref, w2_ref, b2_ref, wsc_ref, masks_ref, o_ref):
        if downsample:
            xph = x_ref[0]                                   # (4, Cin, HW) f32
            # shortcut input: 2x2 average pool == mean of the 4 phases
            x_sc = 0.25 * (xph[0] + xph[1] + xph[2] + xph[3])
            h = xph
            if do_norm:
                m, r = _inorm_stats_3d(xph, 4 * HW)
                h = (h - m) * r * n1w_ref[...] + n1b_ref[...]
            h = _leaky_relu(h).astype(mxu_dtype)
            h_ph = [h[p] for p in range(4)]
            rhs1 = _stack_pooled_taps(h_ph, masks_ref, H, W)  # (9Cin, HW)
        else:
            x = x_ref[0]                                      # (Cin, HW) f32
            x_sc = x
            h = x
            if do_norm:
                m, r = _inorm_stats_2d(x)
                h = (h - m) * r * n1w_ref[...] + n1b_ref[...]
            h = _leaky_relu(h).astype(mxu_dtype)
            rhs1 = _stack_taps(h, masks_ref, H, W)            # (9Cin, HW)

        # conv1 (already pooled when downsample: 1/4 folded into w1)
        y = jnp.dot(w1_ref[...], rhs1,
                    preferred_element_type=jnp.float32) + b1_ref[...]

        if do_norm:
            m2, r2 = _inorm_stats_2d(y)
            y = (y - m2) * r2 * n2w_ref[...] + n2b_ref[...]
        h2 = _leaky_relu(y).astype(mxu_dtype)
        rhs2 = _stack_taps(h2, masks_ref, H, W)
        res = jnp.dot(w2_ref[...], rhs2,
                      preferred_element_type=jnp.float32) + b2_ref[...]

        if learned_sc:
            sc = jnp.dot(wsc_ref[...], x_sc.astype(mxu_dtype),
                         preferred_element_type=jnp.float32)   # 1x1 conv
        else:
            sc = x_sc

        o_ref[0] = (res + sc) * INV_SQRT2

    return kernel


# ------------------------------- host-side glue -------------------------------

def conv3x3_stacked(w):
    # torch (Cout, Cin, 3, 3) -> (Cout, 9*Cin); column order t*Cin + ci, t=ky*3+kx,
    # matching the (9*Cin, HW) tap-stacked activation.
    co, ci, kh, kw = w.shape
    return jnp.transpose(jnp.asarray(w, jnp.float32), (0, 2, 3, 1)).reshape(
        co, kh * kw * ci)


def edge_masks(H, W):
    # (9, 1, HW) {0,1}: row (dy+1)*3+(dx+1) marks positions whose (y+dy, x+dx)
    # neighbour is inside the image (zero padding elsewhere).
    pos = np.arange(H * W)
    yy, xx = pos // W, pos % W
    m = np.zeros((9, 1, H * W), np.float32)
    for t in range(9):
        dy, dx = t // 3 - 1, t % 3 - 1
        m[t, 0] = ((yy + dy >= 0) & (yy + dy < H) &
                   (xx + dx >= 0) & (xx + dx < W)).astype(np.float32)
    return jnp.asarray(m)


def _phase_split(x):
    # (N, C, H, W) -> (N, 4, C, H/2*W/2); phase p = 2a+b holds x[..., 2i+a, 2j+b].
    n, c, h, w = x.shape
    ho, wo = h // 2, w // 2
    x6 = x.reshape(n, c, ho, 2, wo, 2)
    return jnp.transpose(x6, (0, 3, 5, 1, 2, 4)).reshape(n, 4, c, ho * wo)


def resblk_d_forward(x_nchw, params, *, normalize=False, downsample=False,
                     mxu_dtype=jnp.bfloat16):
    x = x_nchw.astype(jnp.float32)
    n, cin, h, w = x.shape
    learned_sc = "sc_w" in params
    cout = params["conv2_w"].shape[0]

    if downsample:
        assert h % 2 == 0 and w % 2 == 0, "avg_pool2d(x, 2) requires even H, W"
        ho, wo = h // 2, w // 2
        x_in = _phase_split(x)                       # (n, 4, cin, ho*wo)
    else:
        ho, wo = h, w
        x_in = x.reshape(n, cin, h * w)
    hwo = ho * wo

    f32 = jnp.float32
    ones_c, zeros_c = jnp.ones((cin, 1), f32), jnp.zeros((cin, 1), f32)
    n1w = params["norm1_w"].reshape(cin, 1).astype(f32) if normalize else ones_c
    n1b = params["norm1_b"].reshape(cin, 1).astype(f32) if normalize else zeros_c
    n2w = params["norm2_w"].reshape(cin, 1).astype(f32) if normalize else ones_c
    n2b = params["norm2_b"].reshape(cin, 1).astype(f32) if normalize else zeros_c

    w1s = conv3x3_stacked(params["conv1_w"])
    if downsample:
        w1s = w1s * 0.25                             # fold avg-pool 1/4 into conv1
    w1s = w1s.astype(mxu_dtype)
    w2s = conv3x3_stacked(params["conv2_w"]).astype(mxu_dtype)
    b1 = params["conv1_b"].reshape(cin, 1).astype(f32)
    b2 = params["conv2_b"].reshape(cout, 1).astype(f32)
    wsc = (params["sc_w"].reshape(cout, cin) if learned_sc
           else jnp.zeros((cout, cin), f32)).astype(mxu_dtype)
    masks = edge_masks(ho, wo).astype(mxu_dtype)

    kernel = make_resblk_kernel(normalize, learned_sc, downsample, ho, wo,
                                mxu_dtype)

    x_spec = (pl.BlockSpec((1, 4, cin, hwo), lambda i: (i, 0, 0, 0)) if downsample
              else pl.BlockSpec((1, cin, hwo), lambda i: (i, 0, 0)))

    def const(shape):
        return pl.BlockSpec(shape, lambda i, _s=shape: (0,) * len(_s))

    # Scoped VMEM sized from the real block footprint (double-buffered image
    # blocks + weights + the in-kernel (9*Cin, HW) stacked conv operands).
    itemsize = jnp.dtype(mxu_dtype).itemsize
    per_img = x_in.nbytes // n + 4 * cout * hwo
    consts = w1s.nbytes + w2s.nbytes + wsc.nbytes + masks.nbytes + 8 * cin * 4
    scratch = 2 * 9 * cin * hwo * itemsize + 6 * max(cin, cout) * hwo * 4
    need = 2 * per_img + 2 * consts + scratch + (4 << 20)
    try:
        vmem_cap = pltpu.get_tpu_info().vmem_capacity_bytes
    except Exception:
        vmem_cap = 64 << 20
    vmem_limit = int(min(max(need, 32 << 20), (vmem_cap * 3) // 4))

    out = pl.pallas_call(
        kernel,
        out_shape=jax.ShapeDtypeStruct((n, cout, hwo), jnp.float32),
        grid=(n,),
        in_specs=[
            x_spec,
            const((cin, 1)), const((cin, 1)),          # norm1 gamma/beta
            const((cin, 9 * cin)), const((cin, 1)),    # conv1 stacked W, bias
            const((cin, 1)), const((cin, 1)),          # norm2 gamma/beta
            const((cout, 9 * cin)), const((cout, 1)),  # conv2 stacked W, bias
            const((cout, cin)),                        # 1x1 shortcut W (dummy if unused)
            const((9, 1, hwo)),                        # precomputed edge masks
        ],
        out_specs=pl.BlockSpec((1, cout, hwo), lambda i: (i, 0, 0)),
        compiler_params=pltpu.CompilerParams(
            dimension_semantics=("parallel",),
            vmem_limit_bytes=vmem_limit),
    )(x_in, n1w, n1b, w1s, b1, n2w, n2b, w2s, b2, wsc, masks)

    return out.reshape(n, cout, ho, wo)


# ------------------------------ pure-JAX reference ---------------------------

def reference_forward(x, params, *, normalize=False, downsample=False):
    x = x.astype(jnp.float32)
    learned_sc = "sc_w" in params

    def lrelu(v):
        return jnp.where(v >= 0, v, LEAKY_SLOPE * v)

    def inorm(v, wgt, bias):
        m = jnp.mean(v, axis=(2, 3), keepdims=True)
        var = jnp.mean((v - m) ** 2, axis=(2, 3), keepdims=True)
        vn = (v - m) / jnp.sqrt(var + EPS)
        return wgt[None, :, None, None] * vn + bias[None, :, None, None]

    def conv(v, wgt, bias=None):
        y = jax.lax.conv_general_dilated(
            v, wgt, (1, 1), "SAME",
            dimension_numbers=("NCHW", "OIHW", "NCHW"))
        return y if bias is None else y + bias[None, :, None, None]

    def pool(v):
        nb, c, hh, ww = v.shape
        return v.reshape(nb, c, hh // 2, 2, ww // 2, 2).mean(axis=(3, 5))

    r = x
    if normalize:
        r = inorm(r, params["norm1_w"], params["norm1_b"])
    r = lrelu(r)
    r = conv(r, params["conv1_w"], params["conv1_b"])
    if downsample:
        r = pool(r)
    if normalize:
        r = inorm(r, params["norm2_w"], params["norm2_b"])
    r = lrelu(r)
    r = conv(r, params["conv2_w"], params["conv2_b"])

    sc = x
    if learned_sc:
        sc = conv(sc, params["sc_w"])
    if downsample:
        sc = pool(sc)
    return (sc + r) * INV_SQRT2


# ----------------------------------- main ------------------------------------

if __name__ == "__main__":
    N, DIM_IN, DIM_OUT, H, W = 2, 4, 8, 16, 16

    key = jax.random.PRNGKey(0)
    ks = jax.random.split(key, 16)
    params = {
        "conv1_w": 0.1 * jax.random.normal(ks[0], (DIM_IN, DIM_IN, 3, 3), jnp.float32),
        "conv1_b": 0.1 * jax.random.normal(ks[1], (DIM_IN,), jnp.float32),
        "conv2_w": 0.1 * jax.random.normal(ks[2], (DIM_OUT, DIM_IN, 3, 3), jnp.float32),
        "conv2_b": 0.1 * jax.random.normal(ks[3], (DIM_OUT,), jnp.float32),
        "norm1_w": 1.0 + 0.1 * jax.random.normal(ks[4], (DIM_IN,), jnp.float32),
        "norm1_b": 0.1 * jax.random.normal(ks[5], (DIM_IN,), jnp.float32),
        "norm2_w": 1.0 + 0.1 * jax.random.normal(ks[6], (DIM_IN,), jnp.float32),
        "norm2_b": 0.1 * jax.random.normal(ks[7], (DIM_IN,), jnp.float32),
        # learned_sc (dim_in != dim_out): 1x1 conv, bias=False
        "sc_w": 0.1 * jax.random.normal(ks[8], (DIM_OUT, DIM_IN, 1, 1), jnp.float32),
    }
    # dim_in == dim_out variant (identity shortcut)
    params_same = {
        "conv1_w": 0.1 * jax.random.normal(ks[11], (DIM_IN, DIM_IN, 3, 3), jnp.float32),
        "conv1_b": 0.1 * jax.random.normal(ks[12], (DIM_IN,), jnp.float32),
        "conv2_w": 0.1 * jax.random.normal(ks[13], (DIM_IN, DIM_IN, 3, 3), jnp.float32),
        "conv2_b": 0.1 * jax.random.normal(ks[14], (DIM_IN,), jnp.float32),
        "norm1_w": params["norm1_w"], "norm1_b": params["norm1_b"],
        "norm2_w": params["norm2_w"], "norm2_b": params["norm2_b"],
    }

    def check(x, prm, normalize, downsample, mxu_dtype, rtol, atol):
        out = jax.block_until_ready(
            resblk_d_forward(x, prm, normalize=normalize, downsample=downsample,
                             mxu_dtype=mxu_dtype))
        ref = reference_forward(x, prm, normalize=normalize, downsample=downsample)
        np.testing.assert_allclose(np.asarray(out), np.asarray(ref),
                                   rtol=rtol, atol=atol)
        return out

    # Case 1: normalize=True, downsample=False, learned shortcut.
    x1 = jax.random.normal(ks[9], (N, DIM_IN, H, W), jnp.float32)
    o1 = check(x1, params, True, False, jnp.float32, 5e-4, 5e-4)   # f32 validation
    assert o1.shape == (N, DIM_OUT, H, W), o1.shape
    check(x1, params, True, False, jnp.bfloat16, 4e-2, 4e-2)       # bf16 perf path

    # Case 2: normalize=False, downsample=True (pooling fused into the kernel).
    x2 = jax.random.normal(ks[10], (N, DIM_IN, 2 * H, 2 * W), jnp.float32)
    o2 = check(x2, params, False, True, jnp.float32, 5e-4, 5e-4)
    assert o2.shape == (N, DIM_OUT, H, W), o2.shape
    check(x2, params, False, True, jnp.bfloat16, 4e-2, 4e-2)

    # Case 3: identity shortcut (dim_in == dim_out), normalize + downsample.
    x3 = jax.random.normal(ks[15], (N, DIM_IN, H, W), jnp.float32)
    o3 = check(x3, params_same, True, True, jnp.float32, 5e-4, 5e-4)
    assert o3.shape == (N, DIM_IN, H // 2, W // 2), o3.shape

    print("KERNEL_OK")
</pallas_src>

<mosaic_0001>
module attributes {stable_mosaic.version = 11 : i64} {
  func.func @kernel(%arg0: i32, %arg1: memref<1x4x256xf32, #tpu.memory_space<vmem>>, %arg2: memref<4x1xf32, #tpu.memory_space<vmem>>, %arg3: memref<4x1xf32, #tpu.memory_space<vmem>>, %arg4: memref<4x36xf32, #tpu.memory_space<vmem>>, %arg5: memref<4x1xf32, #tpu.memory_space<vmem>>, %arg6: memref<4x1xf32, #tpu.memory_space<vmem>>, %arg7: memref<4x1xf32, #tpu.memory_space<vmem>>, %arg8: memref<8x36xf32, #tpu.memory_space<vmem>>, %arg9: memref<8x1xf32, #tpu.memory_space<vmem>>, %arg10: memref<8x4xf32, #tpu.memory_space<vmem>>, %arg11: memref<9x1x256xf32, #tpu.memory_space<vmem>>, %arg12: memref<1x8x256xf32, #tpu.memory_space<vmem>>) attributes {dimension_semantics = [#tpu.dimension_semantics<parallel>], iteration_bounds = array<i64: 2>, scalar_prefetch = 0 : i64, scratch_operands = 0 : i64, tpu.core_type = #tpu.core_type<tc>, window_params = [{transform_indices = @transform_0, window_bounds = array<i64: 1, 4, 256>}, {pipeline_mode = #tpu.pipeline_mode<synchronous>, transform_indices = @transform_1, window_bounds = array<i64: 4, 1>}, {pipeline_mode = #tpu.pipeline_mode<synchronous>, transform_indices = @transform_2, window_bounds = array<i64: 4, 1>}, {pipeline_mode = #tpu.pipeline_mode<synchronous>, transform_indices = @transform_3, window_bounds = array<i64: 4, 36>}, {pipeline_mode = #tpu.pipeline_mode<synchronous>, transform_indices = @transform_4, window_bounds = array<i64: 4, 1>}, {pipeline_mode = #tpu.pipeline_mode<synchronous>, transform_indices = @transform_5, window_bounds = array<i64: 4, 1>}, {pipeline_mode = #tpu.pipeline_mode<synchronous>, transform_indices = @transform_6, window_bounds = array<i64: 4, 1>}, {pipeline_mode = #tpu.pipeline_mode<synchronous>, transform_indices = @transform_7, window_bounds = array<i64: 8, 36>}, {pipeline_mode = #tpu.pipeline_mode<synchronous>, transform_indices = @transform_8, window_bounds = array<i64: 8, 1>}, {pipeline_mode = #tpu.pipeline_mode<synchronous>, transform_indices = @transform_9, window_bounds = array<i64: 8, 4>}, {pipeline_mode = #tpu.pipeline_mode<synchronous>, transform_indices = @transform_10, window_bounds = array<i64: 9, 1, 256>}, {transform_indices = @transform_11, window_bounds = array<i64: 1, 8, 256>}]} {
    %c0 = arith.constant 0 : index
    %c0_0 = arith.constant 0 : index
    %c0_1 = arith.constant 0 : index
    %0 = vector.load %arg1[%c0, %c0_0, %c0_1] : memref<1x4x256xf32, #tpu.memory_space<vmem>>, vector<1x4x256xf32>
    %1 = vector.shape_cast %0 : vector<1x4x256xf32> to vector<4x256xf32>
    %cst = arith.constant dense<0.000000e+00> : vector<4xf32>
    %2 = vector.multi_reduction <add>, %1, %cst [1] : vector<4x256xf32> to vector<4xf32>
    %3 = vector.shape_cast %2 : vector<4xf32> to vector<4x1xf32>
    %cst_2 = arith.constant 2.560000e+02 : f32
    %4 = vector.broadcast %cst_2 : f32 to vector<4x1xf32>
    %5 = arith.divf %3, %4 : vector<4x1xf32>
    %6 = arith.mulf %1, %1 : vector<4x256xf32>
    %cst_3 = arith.constant dense<0.000000e+00> : vector<4xf32>
    %7 = vector.multi_reduction <add>, %6, %cst_3 [1] : vector<4x256xf32> to vector<4xf32>
    %8 = vector.shape_cast %7 : vector<4xf32> to vector<4x1xf32>
    %cst_4 = arith.constant 2.560000e+02 : f32
    %9 = vector.broadcast %cst_4 : f32 to vector<4x1xf32>
    %10 = arith.divf %8, %9 : vector<4x1xf32>
    %11 = arith.mulf %5, %5 : vector<4x1xf32>
    %12 = arith.subf %10, %11 : vector<4x1xf32>
    %cst_5 = arith.constant 0.000000e+00 : f32
    %13 = vector.broadcast %cst_5 : f32 to vector<4x1xf32>
    %14 = arith.maximumf %12, %13 : vector<4x1xf32>
    %cst_6 = arith.constant 9.99999974E-6 : f32
    %15 = vector.broadcast %cst_6 : f32 to vector<4x1xf32>
    %16 = arith.addf %14, %15 : vector<4x1xf32>
    %17 = math.rsqrt %16 : vector<4x1xf32>
    %18 = vector.broadcast %5 : vector<4x1xf32> to vector<4x256xf32>
    %19 = arith.subf %1, %18 : vector<4x256xf32>
    %20 = vector.broadcast %17 : vector<4x1xf32> to vector<4x256xf32>
    %21 = arith.mulf %19, %20 : vector<4x256xf32>
    %c0_7 = arith.constant 0 : index
    %c0_8 = arith.constant 0 : index
    %22 = vector.load %arg2[%c0_7, %c0_8] : memref<4x1xf32, #tpu.memory_space<vmem>>, vector<4x1xf32>
    %23 = vector.broadcast %22 : vector<4x1xf32> to vector<4x256xf32>
    %24 = arith.mulf %21, %23 : vector<4x256xf32>
    %c0_9 = arith.constant 0 : index
    %c0_10 = arith.constant 0 : index
    %25 = vector.load %arg3[%c0_9, %c0_10] : memref<4x1xf32, #tpu.memory_space<vmem>>, vector<4x1xf32>
    %26 = vector.broadcast %25 : vector<4x1xf32> to vector<4x256xf32>
    %27 = arith.addf %24, %26 : vector<4x256xf32>
    %cst_11 = arith.constant 0.000000e+00 : f32
    %28 = vector.broadcast %cst_11 : f32 to vector<4x256xf32>
    %29 = arith.cmpf oge, %27, %28 : vector<4x256xf32>
    %cst_12 = arith.constant 2.000000e-01 : f32
    %30 = vector.broadcast %cst_12 : f32 to vector<4x256xf32>
    %31 = arith.mulf %30, %27 : vector<4x256xf32>
    %32 = arith.select %29, %27, %31 : vector<4x256xi1>, vector<4x256xf32>
    %c17_i32 = arith.constant 17 : i32
    %33 = tpu.dynamic_rotate %32 by %c17_i32 dim 1 : vector<4x256xf32>, i32 -> vector<4x256xf32>
    %c0_13 = arith.constant 0 : index
    %c0_14 = arith.constant 0 : index
    %c0_15 = arith.constant 0 : index
    %34 = vector.load %arg11[%c0_13, %c0_14, %c0_15] : memref<9x1x256xf32, #tpu.memory_space<vmem>>, vector<1x1x256xf32>
    %35 = vector.shape_cast %34 : vector<1x1x256xf32> to vector<1x256xf32>
    %36 = vector.broadcast %35 : vector<1x256xf32> to vector<4x256xf32>
    %37 = arith.mulf %33, %36 : vector<4x256xf32>
    %c16_i32 = arith.constant 16 : i32
    %38 = tpu.dynamic_rotate %32 by %c16_i32 dim 1 : vector<4x256xf32>, i32 -> vector<4x256xf32>
    %c1 = arith.constant 1 : index
    %c0_16 = arith.constant 0 : index
    %c0_17 = arith.constant 0 : index
    %39 = vector.load %arg11[%c1, %c0_16, %c0_17] : memref<9x1x256xf32, #tpu.memory_space<vmem>>, vector<1x1x256xf32>
    %40 = vector.shape_cast %39 : vector<1x1x256xf32> to vector<1x256xf32>
    %41 = vector.broadcast %40 : vector<1x256xf32> to vector<4x256xf32>
    %42 = arith.mulf %38, %41 : vector<4x256xf32>
    %c15_i32 = arith.constant 15 : i32
    %43 = tpu.dynamic_rotate %32 by %c15_i32 dim 1 : vector<4x256xf32>, i32 -> vector<4x256xf32>
    %c2 = arith.constant 2 : index
    %c0_18 = arith.constant 0 : index
    %c0_19 = arith.constant 0 : index
    %44 = vector.load %arg11[%c2, %c0_18, %c0_19] : memref<9x1x256xf32, #tpu.memory_space<vmem>>, vector<1x1x256xf32>
    %45 = vector.shape_cast %44 : vector<1x1x256xf32> to vector<1x256xf32>
    %46 = vector.broadcast %45 : vector<1x256xf32> to vector<4x256xf32>
    %47 = arith.mulf %43, %46 : vector<4x256xf32>
    %c1_i32 = arith.constant 1 : i32
    %48 = tpu.dynamic_rotate %32 by %c1_i32 dim 1 : vector<4x256xf32>, i32 -> vector<4x256xf32>
    %c3 = arith.constant 3 : index
    %c0_20 = arith.constant 0 : index
    %c0_21 = arith.constant 0 : index
    %49 = vector.load %arg11[%c3, %c0_20, %c0_21] : memref<9x1x256xf32, #tpu.memory_space<vmem>>, vector<1x1x256xf32>
    %50 = vector.shape_cast %49 : vector<1x1x256xf32> to vector<1x256xf32>
    %51 = vector.broadcast %50 : vector<1x256xf32> to vector<4x256xf32>
    %52 = arith.mulf %48, %51 : vector<4x256xf32>
    %c255_i32 = arith.constant 255 : i32
    %53 = tpu.dynamic_rotate %32 by %c255_i32 dim 1 : vector<4x256xf32>, i32 -> vector<4x256xf32>
    %c5 = arith.constant 5 : index
    %c0_22 = arith.constant 0 : index
    %c0_23 = arith.constant 0 : index
    %54 = vector.load %arg11[%c5, %c0_22, %c0_23] : memref<9x1x256xf32, #tpu.memory_space<vmem>>, vector<1x1x256xf32>
    %55 = vector.shape_cast %54 : vector<1x1x256xf32> to vector<1x256xf32>
    %56 = vector.broadcast %55 : vector<1x256xf32> to vector<4x256xf32>
    %57 = arith.mulf %53, %56 : vector<4x256xf32>
    %c241_i32 = arith.constant 241 : i32
    %58 = tpu.dynamic_rotate %32 by %c241_i32 dim 1 : vector<4x256xf32>, i32 -> vector<4x256xf32>
    %c6 = arith.constant 6 : index
    %c0_24 = arith.constant 0 : index
    %c0_25 = arith.constant 0 : index
    %59 = vector.load %arg11[%c6, %c0_24, %c0_25] : memref<9x1x256xf32, #tpu.memory_space<vmem>>, vector<1x1x256xf32>
    %60 = vector.shape_cast %59 : vector<1x1x256xf32> to vector<1x256xf32>
    %61 = vector.broadcast %60 : vector<1x256xf32> to vector<4x256xf32>
    %62 = arith.mulf %58, %61 : vector<4x256xf32>
    %c240_i32 = arith.constant 240 : i32
    %63 = tpu.dynamic_rotate %32 by %c240_i32 dim 1 : vector<4x256xf32>, i32 -> vector<4x256xf32>
    %c7 = arith.constant 7 : index
    %c0_26 = arith.constant 0 : index
    %c0_27 = arith.constant 0 : index
    %64 = vector.load %arg11[%c7, %c0_26, %c0_27] : memref<9x1x256xf32, #tpu.memory_space<vmem>>, vector<1x1x256xf32>
    %65 = vector.shape_cast %64 : vector<1x1x256xf32> to vector<1x256xf32>
    %66 = vector.broadcast %65 : vector<1x256xf32> to vector<4x256xf32>
    %67 = arith.mulf %63, %66 : vector<4x256xf32>
    %c239_i32 = arith.constant 239 : i32
    %68 = tpu.dynamic_rotate %32 by %c239_i32 dim 1 : vector<4x256xf32>, i32 -> vector<4x256xf32>
    %c8 = arith.constant 8 : index
    %c0_28 = arith.constant 0 : index
    %c0_29 = arith.constant 0 : index
    %69 = vector.load %arg11[%c8, %c0_28, %c0_29] : memref<9x1x256xf32, #tpu.memory_space<vmem>>, vector<1x1x256xf32>
    %70 = vector.shape_cast %69 : vector<1x1x256xf32> to vector<1x256xf32>
    %71 = vector.broadcast %70 : vector<1x256xf32> to vector<4x256xf32>
    %72 = arith.mulf %68, %71 : vector<4x256xf32>
    %73 = tpu.concatenate %37, %42, %47, %52, %32, %57, %62, %67, %72 in 0 : vector<4x256xf32>, vector<4x256xf32>, vector<4x256xf32>, vector<4x256xf32>, vector<4x256xf32>, vector<4x256xf32>, vector<4x256xf32>, vector<4x256xf32>, vector<4x256xf32> -> vector<36x256xf32>
    %c0_30 = arith.constant 0 : index
    %c0_31 = arith.constant 0 : index
    %74 = vector.load %arg4[%c0_30, %c0_31] : memref<4x36xf32, #tpu.memory_space<vmem>>, vector<4x36xf32>
    %cst_32 = arith.constant dense<0.000000e+00> : vector<4x256xf32>
    %75 = tpu.matmul %74, %73, %cst_32 {dimension_numbers = #tpu.dot_dimension_numbers<[1], [0], [0], [1], [0, 0, 1, 1], [], []>} : vector<4x36xf32>, vector<36x256xf32>, vector<4x256xf32> -> vector<4x256xf32>
    %c0_33 = arith.constant 0 : index
    %c0_34 = arith.constant 0 : index
    %76 = vector.load %arg5[%c0_33, %c0_34] : memref<4x1xf32, #tpu.memory_space<vmem>>, vector<4x1xf32>
    %77 = vector.broadcast %76 : vector<4x1xf32> to vector<4x256xf32>
    %78 = arith.addf %75, %77 : vector<4x256xf32>
    %cst_35 = arith.constant dense<0.000000e+00> : vector<4xf32>
    %79 = vector.multi_reduction <add>, %78, %cst_35 [1] : vector<4x256xf32> to vector<4xf32>
    %80 = vector.shape_cast %79 : vector<4xf32> to vector<4x1xf32>
    %cst_36 = arith.constant 2.560000e+02 : f32
    %81 = vector.broadcast %cst_36 : f32 to vector<4x1xf32>
    %82 = arith.divf %80, %81 : vector<4x1xf32>
    %83 = arith.mulf %78, %78 : vector<4x256xf32>
    %cst_37 = arith.constant dense<0.000000e+00> : vector<4xf32>
    %84 = vector.multi_reduction <add>, %83, %cst_37 [1] : vector<4x256xf32> to vector<4xf32>
    %85 = vector.shape_cast %84 : vector<4xf32> to vector<4x1xf32>
    %cst_38 = arith.constant 2.560000e+02 : f32
    %86 = vector.broadcast %cst_38 : f32 to vector<4x1xf32>
    %87 = arith.divf %85, %86 : vector<4x1xf32>
    %88 = arith.mulf %82, %82 : vector<4x1xf32>
    %89 = arith.subf %87, %88 : vector<4x1xf32>
    %cst_39 = arith.constant 0.000000e+00 : f32
    %90 = vector.broadcast %cst_39 : f32 to vector<4x1xf32>
    %91 = arith.maximumf %89, %90 : vector<4x1xf32>
    %cst_40 = arith.constant 9.99999974E-6 : f32
    %92 = vector.broadcast %cst_40 : f32 to vector<4x1xf32>
    %93 = arith.addf %91, %92 : vector<4x1xf32>
    %94 = math.rsqrt %93 : vector<4x1xf32>
    %95 = vector.broadcast %82 : vector<4x1xf32> to vector<4x256xf32>
    %96 = arith.subf %78, %95 : vector<4x256xf32>
    %97 = vector.broadcast %94 : vector<4x1xf32> to vector<4x256xf32>
    %98 = arith.mulf %96, %97 : vector<4x256xf32>
    %c0_41 = arith.constant 0 : index
    %c0_42 = arith.constant 0 : index
    %99 = vector.load %arg6[%c0_41, %c0_42] : memref<4x1xf32, #tpu.memory_space<vmem>>, vector<4x1xf32>
    %100 = vector.broadcast %99 : vector<4x1xf32> to vector<4x256xf32>
    %101 = arith.mulf %98, %100 : vector<4x256xf32>
    %c0_43 = arith.constant 0 : index
    %c0_44 = arith.constant 0 : index
    %102 = vector.load %arg7[%c0_43, %c0_44] : memref<4x1xf32, #tpu.memory_space<vmem>>, vector<4x1xf32>
    %103 = vector.broadcast %102 : vector<4x1xf32> to vector<4x256xf32>
    %104 = arith.addf %101, %103 : vector<4x256xf32>
    %cst_45 = arith.constant 0.000000e+00 : f32
    %105 = vector.broadcast %cst_45 : f32 to vector<4x256xf32>
    %106 = arith.cmpf oge, %104, %105 : vector<4x256xf32>
    %cst_46 = arith.constant 2.000000e-01 : f32
    %107 = vector.broadcast %cst_46 : f32 to vector<4x256xf32>
    %108 = arith.mulf %107, %104 : vector<4x256xf32>
    %109 = arith.select %106, %104, %108 : vector<4x256xi1>, vector<4x256xf32>
    %c17_i32_47 = arith.constant 17 : i32
    %110 = tpu.dynamic_rotate %109 by %c17_i32_47 dim 1 : vector<4x256xf32>, i32 -> vector<4x256xf32>
    %c0_48 = arith.constant 0 : index
    %c0_49 = arith.constant 0 : index
    %c0_50 = arith.constant 0 : index
    %111 = vector.load %arg11[%c0_48, %c0_49, %c0_50] : memref<9x1x256xf32, #tpu.memory_space<vmem>>, vector<1x1x256xf32>
    %112 = vector.shape_cast %111 : vector<1x1x256xf32> to vector<1x256xf32>
    %113 = vector.broadcast %112 : vector<1x256xf32> to vector<4x256xf32>
    %114 = arith.mulf %110, %113 : vector<4x256xf32>
    %c16_i32_51 = arith.constant 16 : i32
    %115 = tpu.dynamic_rotate %109 by %c16_i32_51 dim 1 : vector<4x256xf32>, i32 -> vector<4x256xf32>
    %c1_52 = arith.constant 1 : index
    %c0_53 = arith.constant 0 : index
    %c0_54 = arith.constant 0 : index
    %116 = vector.load %arg11[%c1_52, %c0_53, %c0_54] : memref<9x1x256xf32, #tpu.memory_space<vmem>>, vector<1x1x256xf32>
    %117 = vector.shape_cast %116 : vector<1x1x256xf32> to vector<1x256xf32>
    %118 = vector.broadcast %117 : vector<1x256xf32> to vector<4x256xf32>
    %119 = arith.mulf %115, %118 : vector<4x256xf32>
    %c15_i32_55 = arith.constant 15 : i32
    %120 = tpu.dynamic_rotate %109 by %c15_i32_55 dim 1 : vector<4x256xf32>, i32 -> vector<4x256xf32>
    %c2_56 = arith.constant 2 : index
    %c0_57 = arith.constant 0 : index
    %c0_58 = arith.constant 0 : index
    %121 = vector.load %arg11[%c2_56, %c0_57, %c0_58] : memref<9x1x256xf32, #tpu.memory_space<vmem>>, vector<1x1x256xf32>
    %122 = vector.shape_cast %121 : vector<1x1x256xf32> to vector<1x256xf32>
    %123 = vector.broadcast %122 : vector<1x256xf32> to vector<4x256xf32>
    %124 = arith.mulf %120, %123 : vector<4x256xf32>
    %c1_i32_59 = arith.constant 1 : i32
    %125 = tpu.dynamic_rotate %109 by %c1_i32_59 dim 1 : vector<4x256xf32>, i32 -> vector<4x256xf32>
    %c3_60 = arith.constant 3 : index
    %c0_61 = arith.constant 0 : index
    %c0_62 = arith.constant 0 : index
    %126 = vector.load %arg11[%c3_60, %c0_61, %c0_62] : memref<9x1x256xf32, #tpu.memory_space<vmem>>, vector<1x1x256xf32>
    %127 = vector.shape_cast %126 : vector<1x1x256xf32> to vector<1x256xf32>
    %128 = vector.broadcast %127 : vector<1x256xf32> to vector<4x256xf32>
    %129 = arith.mulf %125, %128 : vector<4x256xf32>
    %c255_i32_63 = arith.constant 255 : i32
    %130 = tpu.dynamic_rotate %109 by %c255_i32_63 dim 1 : vector<4x256xf32>, i32 -> vector<4x256xf32>
    %c5_64 = arith.constant 5 : index
    %c0_65 = arith.constant 0 : index
    %c0_66 = arith.constant 0 : index
    %131 = vector.load %arg11[%c5_64, %c0_65, %c0_66] : memref<9x1x256xf32, #tpu.memory_space<vmem>>, vector<1x1x256xf32>
    %132 = vector.shape_cast %131 : vector<1x1x256xf32> to vector<1x256xf32>
    %133 = vector.broadcast %132 : vector<1x256xf32> to vector<4x256xf32>
    %134 = arith.mulf %130, %133 : vector<4x256xf32>
    %c241_i32_67 = arith.constant 241 : i32
    %135 = tpu.dynamic_rotate %109 by %c241_i32_67 dim 1 : vector<4x256xf32>, i32 -> vector<4x256xf32>
    %c6_68 = arith.constant 6 : index
    %c0_69 = arith.constant 0 : index
    %c0_70 = arith.constant 0 : index
    %136 = vector.load %arg11[%c6_68, %c0_69, %c0_70] : memref<9x1x256xf32, #tpu.memory_space<vmem>>, vector<1x1x256xf32>
    %137 = vector.shape_cast %136 : vector<1x1x256xf32> to vector<1x256xf32>
    %138 = vector.broadcast %137 : vector<1x256xf32> to vector<4x256xf32>
    %139 = arith.mulf %135, %138 : vector<4x256xf32>
    %c240_i32_71 = arith.constant 240 : i32
    %140 = tpu.dynamic_rotate %109 by %c240_i32_71 dim 1 : vector<4x256xf32>, i32 -> vector<4x256xf32>
    %c7_72 = arith.constant 7 : index
    %c0_73 = arith.constant 0 : index
    %c0_74 = arith.constant 0 : index
    %141 = vector.load %arg11[%c7_72, %c0_73, %c0_74] : memref<9x1x256xf32, #tpu.memory_space<vmem>>, vector<1x1x256xf32>
    %142 = vector.shape_cast %141 : vector<1x1x256xf32> to vector<1x256xf32>
    %143 = vector.broadcast %142 : vector<1x256xf32> to vector<4x256xf32>
    %144 = arith.mulf %140, %143 : vector<4x256xf32>
    %c239_i32_75 = arith.constant 239 : i32
    %145 = tpu.dynamic_rotate %109 by %c239_i32_75 dim 1 : vector<4x256xf32>, i32 -> vector<4x256xf32>
    %c8_76 = arith.constant 8 : index
    %c0_77 = arith.constant 0 : index
    %c0_78 = arith.constant 0 : index
    %146 = vector.load %arg11[%c8_76, %c0_77, %c0_78] : memref<9x1x256xf32, #tpu.memory_space<vmem>>, vector<1x1x256xf32>
    %147 = vector.shape_cast %146 : vector<1x1x256xf32> to vector<1x256xf32>
    %148 = vector.broadcast %147 : vector<1x256xf32> to vector<4x256xf32>
    %149 = arith.mulf %145, %148 : vector<4x256xf32>
    %150 = tpu.concatenate %114, %119, %124, %129, %109, %134, %139, %144, %149 in 0 : vector<4x256xf32>, vector<4x256xf32>, vector<4x256xf32>, vector<4x256xf32>, vector<4x256xf32>, vector<4x256xf32>, vector<4x256xf32>, vector<4x256xf32>, vector<4x256xf32> -> vector<36x256xf32>
    %c0_79 = arith.constant 0 : index
    %c0_80 = arith.constant 0 : index
    %151 = vector.load %arg8[%c0_79, %c0_80] : memref<8x36xf32, #tpu.memory_space<vmem>>, vector<8x36xf32>
    %cst_81 = arith.constant dense<0.000000e+00> : vector<8x256xf32>
    %152 = tpu.matmul %151, %150, %cst_81 {dimension_numbers = #tpu.dot_dimension_numbers<[1], [0], [0], [1], [0, 0, 1, 1], [], []>} : vector<8x36xf32>, vector<36x256xf32>, vector<8x256xf32> -> vector<8x256xf32>
    %c0_82 = arith.constant 0 : index
    %c0_83 = arith.constant 0 : index
    %153 = vector.load %arg9[%c0_82, %c0_83] : memref<8x1xf32, #tpu.memory_space<vmem>>, vector<8x1xf32>
    %154 = vector.broadcast %153 : vector<8x1xf32> to vector<8x256xf32>
    %155 = arith.addf %152, %154 : vector<8x256xf32>
    %c0_84 = arith.constant 0 : index
    %c0_85 = arith.constant 0 : index
    %156 = vector.load %arg10[%c0_84, %c0_85] : memref<8x4xf32, #tpu.memory_space<vmem>>, vector<8x4xf32>
    %cst_86 = arith.constant dense<0.000000e+00> : vector<8x256xf32>
    %157 = tpu.matmul %156, %1, %cst_86 {dimension_numbers = #tpu.dot_dimension_numbers<[1], [0], [0], [1], [0, 0, 1, 1], [], []>} : vector<8x4xf32>, vector<4x256xf32>, vector<8x256xf32> -> vector<8x256xf32>
    %158 = arith.addf %155, %157 : vector<8x256xf32>
    %cst_87 = arith.constant 0.707106769 : f32
    %159 = vector.broadcast %cst_87 : f32 to vector<8x256xf32>
    %160 = arith.mulf %158, %159 : vector<8x256xf32>
    %c0_88 = arith.constant 0 : index
    %c0_89 = arith.constant 0 : index
    %c0_90 = arith.constant 0 : index
    %161 = vector.load %arg12[%c0_88, %c0_89, %c0_90] : memref<1x8x256xf32, #tpu.memory_space<vmem>>, vector<1x8x256xf32>
    %162 = vector.shape_cast %161 : vector<1x8x256xf32> to vector<8x256xf32>
    %163 = vector.shape_cast %160 : vector<8x256xf32> to vector<1x8x256xf32>
    tpu.vector_store %arg12[%c0_88, %c0_89, %c0_90], %163 {strides = array<i32>} : memref<1x8x256xf32, #tpu.memory_space<vmem>>, vector<1x8x256xf32>,
    return
  }
  func.func @transform_0(%arg0: i32) -> (i32, i32, i32) {
    %c0_i32 = arith.constant 0 : i32
    %c0_i32_0 = arith.constant 0 : i32
    %c0_i32_1 = arith.constant 0 : i32
    return %arg0, %c0_i32, %c0_i32_0 : i32, i32, i32
  }
  func.func @transform_1(%arg0: i32) -> (i32, i32) {
    %c0_i32 = arith.constant 0 : i32
    %c0_i32_0 = arith.constant 0 : i32
    %c0_i32_1 = arith.constant 0 : i32
    return %c0_i32, %c0_i32_0 : i32, i32
  }
  func.func @transform_2(%arg0: i32) -> (i32, i32) {
    %c0_i32 = arith.constant 0 : i32
    %c0_i32_0 = arith.constant 0 : i32
    %c0_i32_1 = arith.constant 0 : i32
    return %c0_i32, %c0_i32_0 : i32, i32
  }
  func.func @transform_3(%arg0: i32) -> (i32, i32) {
    %c0_i32 = arith.constant 0 : i32
    %c0_i32_0 = arith.constant 0 : i32
    %c0_i32_1 = arith.constant 0 : i32
    return %c0_i32, %c0_i32_0 : i32, i32
  }
  func.func @transform_4(%arg0: i32) -> (i32, i32) {
    %c0_i32 = arith.constant 0 : i32
    %c0_i32_0 = arith.constant 0 : i32
    %c0_i32_1 = arith.constant 0 : i32
    return %c0_i32, %c0_i32_0 : i32, i32
  }
  func.func @transform_5(%arg0: i32) -> (i32, i32) {
    %c0_i32 = arith.constant 0 : i32
    %c0_i32_0 = arith.constant 0 : i32
    %c0_i32_1 = arith.constant 0 : i32
    return %c0_i32, %c0_i32_0 : i32, i32
  }
  func.func @transform_6(%arg0: i32) -> (i32, i32) {
    %c0_i32 = arith.constant 0 : i32
    %c0_i32_0 = arith.constant 0 : i32
    %c0_i32_1 = arith.constant 0 : i32
    return %c0_i32, %c0_i32_0 : i32, i32
  }
  func.func @transform_7(%arg0: i32) -> (i32, i32) {
    %c0_i32 = arith.constant 0 : i32
    %c0_i32_0 = arith.constant 0 : i32
    %c0_i32_1 = arith.constant 0 : i32
    return %c0_i32, %c0_i32_0 : i32, i32
  }
  func.func @transform_8(%arg0: i32) -> (i32, i32) {
    %c0_i32 = arith.constant 0 : i32
    %c0_i32_0 = arith.constant 0 : i32
    %c0_i32_1 = arith.constant 0 : i32
    return %c0_i32, %c0_i32_0 : i32, i32
  }
  func.func @transform_9(%arg0: i32) -> (i32, i32) {
    %c0_i32 = arith.constant 0 : i32
    %c0_i32_0 = arith.constant 0 : i32
    %c0_i32_1 = arith.constant 0 : i32
    return %c0_i32, %c0_i32_0 : i32, i32
  }
  func.func @transform_10(%arg0: i32) -> (i32, i32, i32) {
    %c0_i32 = arith.constant 0 : i32
    %c0_i32_0 = arith.constant 0 : i32
    %c0_i32_1 = arith.constant 0 : i32
    %c0_i32_2 = arith.constant 0 : i32
    return %c0_i32, %c0_i32_0, %c0_i32_1 : i32, i32, i32
  }
  func.func @transform_11(%arg0: i32) -> (i32, i32, i32) {
    %c0_i32 = arith.constant 0 : i32
    %c0_i32_0 = arith.constant 0 : i32
    %c0_i32_1 = arith.constant 0 : i32
    return %arg0, %c0_i32, %c0_i32_0 : i32, i32, i32
  }
}

</mosaic_0001>

<bundles_post_ra>
// kernel: tpu_custom_call.1
= control target key start
LH: loop header
LB: loop body
LE: loop exit
PB: predicated region body
PF: predicated region fallthrough
CT: control target
= control target key end

     0   :  { %s1833_s0 = inlined_call_operand.vmem [shape: f32[2,4,256], index: 0, kind: input, shape index: {}]   ;;  %s1834_s1 = inlined_call_operand.vmem [shape: f32[4,1], index: 1, kind: input, shape index: {}]   ;;  %s1835_s2 = inlined_call_operand.vmem [shape: f32[4,1], index: 2, kind: input, shape index: {}]   ;;  %s1836_s3 = inlined_call_operand.vmem [shape: f32[4,36], index: 3, kind: input, shape index: {}]   ;;  %s1837_s4 = inlined_call_operand.vmem [shape: f32[4,1], index: 4, kind: input, shape index: {}]   ;;  %s1838_s5 = inlined_call_operand.vmem [shape: f32[4,1], index: 5, kind: input, shape index: {}]   ;;  %s1839_s6 = inlined_call_operand.vmem [shape: f32[4,1], index: 6, kind: input, shape index: {}]   ;;  %s1840_s7 = inlined_call_operand.vmem [shape: f32[8,36], index: 7, kind: input, shape index: {}]   ;;  %s1841_s8 = inlined_call_operand.vmem [shape: f32[8,1], index: 8, kind: input, shape index: {}]   ;;  %s1842_s9 = inlined_call_operand.vmem [shape: f32[8,4], index: 9, kind: input, shape index: {}]   ;;  %s1843_s10 = inlined_call_operand.vmem [shape: f32[9,1,256], index: 10, kind: input, shape index: {}]   ;;  %s1844_s11 = inlined_call_operand.hbm [shape: f32[2,8,256], index: 11, kind: output, shape index: {}]  }
   0x1   :  { %1857 = sst [smem:[#allocation5_spill]] %s1833_s0 }
   0x2   :  { %16 = vsyncpa [#allocation3], 0 }
   0x3   :  { %18 = vsyncpa [#allocation3 + $0x1], 0  ;;  %s1394_s17 = smov 0   ;;  %s1396_s18 = smov 0  }
   0x4   :  { %s1398_s19 = smov 0   ;;  %s1400_s20 = smov 0  }
   0x5 LB: > { %s1415_s21 = sadd.s32 4294967295, %s1320_s20   ;;  %s1151_s22 = sadd.s32 4294967294, %s1320_s20   ;;  %s1320_s20 = sphi %s1400_s20, %s1870_s20   ;;  %s1316_s19 = sphi %s1398_s19, %s1869_s19   ;;  %s1312_s18 = sphi %s1396_s18, %s1868_s18   ;;  %s1308_s17 = sphi %s1394_s17, %s1867_s17  }
   0x6   : > { %s1419_s23 = sadd.s32 1, %s1320_s20   ;;  %s267_s24 = sadd.s32 1, %s1316_s19 }
   0x7   : > { %s264_s25 = ssub.s32 %s1320_s20, %s1419_s23  ;;  %p277_p0 = scmp.ne.s32.totalorder %s1316_s19, %s1312_s18 }
   0x8   : > { %p265_p1 = scmp.eq.s32.totalorder %s264_s25, 0  ;;  %p278_p2 = scmp.eq.s32.totalorder %s1415_s21, 1 }
   0x9   : > { %p283_p3 = scmp.ne.s32.totalorder %s1312_s18, %s1308_s17  ;;  %p284_p4 = scmp.eq.s32.totalorder %s1151_s22, 1 }
   0xa   : > { %s1430_s26 = scalar_select %p265_p1, %s1316_s19, %s267_s24  }
   0xb   : > { %p1432_p5 = por %p278_p2, %p277_p0  ;;  %p1436_p6 = por %p284_p4, %p283_p3 }
   0xc   : > { %p1154_p7 = scmp.ge.s32.totalorder %s1320_s20, 1  ;;  %p340_p8 = scmp.lt.s32.totalorder %s1320_s20, 3 }
   0xe   : > { %p341_p9 = pnand %p1154_p7, %p340_p8 }
   0xf   : > { %p380_p10 = scmp.lt.s32.totalorder (!%p341_p9), %s1415_s21, 1  ;;  %v432_v0 = vld [vmem:[%s1834_s1] sm:$0xf] (!%p341_p9)  ;;  %v1322_v1 = vmov (!%p341_p9), 0   ;;  %vm389_vm0 = vcmask (!%p341_p9), 1043456   ;;  %s1860_s0 = sld [smem:[#allocation5_spill]] (!%p341_p9)  ;;  %v416_v21 = vlaneseq (!%p341_p9) }
  0x10   : > { %344 = sbr.rel (%p341_p9) target bundleno = 1156 (0x484), region = 64  ;;  %1251 = vset.pattern.permute.xlu1 (!%p341_p9), %v1322_v1  ;;  %1252 = vset.pattern.permute.xlu0 (!%p341_p9), %v1322_v1  ;;  %v446_v2 = vld [vmem:[%s1835_s2] sm:$0xf] (!%p341_p9)  ;;  %v1323_v19 = vmov (!%p341_p9), 839922192   ;;  %s1851_s25 = smov (!%p341_p9), 1  }
  0x11   : > { %435 = vperm.xlu1 (!%p341_p9), %1251, %v432_v0   ;;  %v414_v20 = vunpack.c.l.s4 (!%p341_p9), %v1323_v19  ;;  %v417_v25 = vshrl.u32 (!%p341_p9), %v416_v21, 7  ;;  %s1325_s29 = smov (!%p341_p9), 16   ;;  %s1326_s30 = smov (!%p341_p9), 17   ;;  %v1332_v41 = vmov (!%p341_p9), 0.0   ;;  %v676_v42 = vld [vmem:[%s1837_s4] sm:$0xf] (!%p341_p9) }
  0x12   : > { %s1853_s13 = smov (!%p341_p9), 127   ;;  %s1849_s14 = smov (!%p341_p9), 112   ;;  %756 = vmatprep.mubr.f32.mxu0 (!%p341_p9), %v1332_v41  ;;  %984 = vmatprep.mubr.f32.mxu1 (!%p341_p9), %v1332_v41  ;;  %v1513_v49 = vand.u32 (!%p341_p9), 127, %v416_v21  ;;  %v1159_v52 = vld [vmem:[%s1843_s10 + $0x4] sm:$0x3] (!%p341_p9)  ;;  %vm682_vm10 = vcmask (!%p341_p9), 293888  }
  0x13   : > { %v415_v24 = vunpack.c.0.s8 (!%p341_p9), %v414_v20  ;;  %s1847_s16 = smov (!%p341_p9), 111   ;;  %v1515_v50 = vsub.s32 (!%p341_p9), 0, %v417_v25  ;;  %v1517_v51 = vsub.s32 (!%p341_p9), 1, %v417_v25  ;;  %v1161_v53 = vld [vmem:[%s1843_s10 + $0xa] sm:$0x3] (!%p341_p9)  ;;  %s1861_s22 = smov (!%p341_p9), 15  }
  0x14   : > { %v1163_v55 = vld [vmem:[%s1843_s10 + $0xe] sm:$0x3] (!%p341_p9)  ;;  %vm515_vm2 = vcmp.lt.s32.totalorder (!%p341_p9), %v1513_v49, 15  ;;  %v1158_v57 = vld [vmem:[%s1843_s10 + $0x2] sm:$0x3] (!%p341_p9)  ;;  %vm559_vm3 = vcmp.lt.s32.totalorder (!%p341_p9), %v1513_v49, 127 }
  0x15   : > { %449 = vperm.xlu1 (!%p341_p9), %1251, %v446_v2   ;;  %v418_v26 = vsub.s32 (!%p341_p9), %v415_v24, %v417_v25  ;;  %v1533_v58 = vrot.slane (!%p341_p9), %v1159_v52, %v1515_v50  ;;  %v1536_v59 = vrot.slane (!%p341_p9), %v1159_v52, %v1517_v51  ;;  %v1540_v60 = vrot.slane (!%p341_p9), %v1161_v53, %v1515_v50  ;;  %v1160_v61 = vld [vmem:[%s1843_s10 + $0x6] sm:$0x3] (!%p341_p9)  ;;  %v475_v62 = vld [vmem:[%s1843_s10] sm:$0x3] (!%p341_p9)  ;;  %v1162_v19 = vld [vmem:[%s1843_s10 + $0xc] sm:$0x3] (!%p341_p9) }
  0x16   : > { %v1549_v63 = vrot.slane (!%p341_p9), %v1161_v53, %v1517_v51  ;;  %vm603_vm4 = vcmp.lt.s32.totalorder (!%p341_p9), %v1513_v49, 112  ;;  %v1553_v0 = vrot.slane (!%p341_p9), %v1163_v55, %v1515_v50  ;;  %vm493_vm5 = vcmp.lt.s32.totalorder (!%p341_p9), %v1513_v49, 16 }
  0x17   : > { %s381_s12 = scalar_select %p380_p10, %s1415_s21, 1  ;;  %v1557_v2 = vrot.slane %v1163_v55, %v1517_v51  ;;  %vm537_vm6 = vcmp.lt.s32.totalorder %v1513_v49, 1  ;;  %vm472_vm7 = vcmp.lt.s32.totalorder %v1513_v49, 17  ;;  %vm581_vm8 = vcmp.lt.s32.totalorder %v1513_v49, 113 }
  0x18   : > { %vm625_vm9 = vcmp.lt.s32.totalorder %v1513_v49, 111  ;;  %v991_v49 = vld [vmem:[%s1842_s9] sm:$0xff]  ;;  %vm992_vm13 = vcmask 31744  }
  0x19   : > { %s1179_s15 = sshll.u32 %s381_s12, 3  ;;  %s1855_s12 = smov 15  }
  0x1a   : > { %s384_s24 = scalar_lea.vmem %s1860_s0, %s1179_s15  ;;  %s1845_s15 = smov 113  }
  0x1b   : > { %v1453_v3 = vld [vmem:[%s384_s24] sm:$0xff]  ;;  %s1862_s24 = smov 127  }
  0x1c   : > { %v1457_v4 = vcombine.high %v1453_v3, %v1453_v3  ;;  %v390_v5 = vsel %vm389_vm0, %v1453_v3, 0.0  ;;  %v397_v6 = vmul.f32 %v1453_v3, %v1453_v3 }
  0x1e   : > { %v391_v7 = vsel %vm389_vm0, %v1457_v4, 0.0  ;;  %v399_v8 = vcombine.high %v397_v6, %v397_v6  ;;  %v401_v9 = vsel %vm389_vm0, %v397_v6, 0.0  ;;  %v1563_v6 = vrot.slane %v1158_v57, %v1517_v51 }
  0x1f   : > { %v392_v10 = vadd.f32 %v391_v7, %v390_v5  ;;  %v1560_v5 = vrot.slane %v1158_v57, %v1515_v50  ;;  %v1567_v7 = vrot.slane %v1160_v61, %v1515_v50 }
  0x20   : > { %v402_v11 = vsel %vm389_vm0, %v399_v8, 0.0  ;;  %v1570_v8 = vrot.slane %v1160_v61, %v1517_v51 }
  0x21   : > { %393 = vadd.xlane.f32.xlu0 %v392_v10  ;;  %v403_v12 = vadd.f32 %v402_v11, %v401_v9  ;;  %v1574_v9 = vrot.slane %v475_v62, %v1515_v50 }
  0x25   : > { %404 = vadd.xlane.f32.xlu0 %v403_v12  ;;  %v1581_v12 = vrot.slane %v475_v62, %v1517_v51 }
  0x90   : > { %v436_v27 = vpop.permute.xlu1 %435 }
  0x91   : > { %v443_v34 = vrot.slane %v436_v27, %v418_v26 }
  0x94   : > { %v450_v32 = vpop.permute.xlu1 %449 }
  0x95   : > { %v457_v36 = vrot.slane %v450_v32, %v418_v26 }
  0xae   : > { %v394_v13 = vpop.xlane.xlu0 %393 }
  0xaf   : > { %v396_v14 = vmul.f32 0.00390625, %v394_v13 }
  0xb1   : > { %v407_v16 = vmul.f32 %v396_v14, %v396_v14  ;;  %v419_v28 = vrot.slane %v396_v14, %v418_v26 }
  0xb2   : > { %v405_v15 = vpop.xlane.xlu0 %404 }
  0xb3   : > { %v406_v17 = vmul.f32 0.00390625, %v405_v15  ;;  %v421_v30 = vsub.f32 %v1453_v3, %v419_v28 }
  0xb5   : > { %v408_v18 = vsub.f32 %v406_v17, %v407_v16 }
  0xb7   : > { %v409_v22 = vmax.f32 %v408_v18, 0.0 }
  0xb9   : > { %v410_v23 = vadd.f32 1e-05, %v409_v22 }
  0xbb   : > { %1254 = vrsqrt.f32 %v410_v23 }
  0xc5   : > { %v1255_v29 = vpop.eup %1254 }
  0xc6   : > { %v429_v31 = vrot.slane %v1255_v29, %v418_v26 }
  0xc8   : > { %v431_v33 = vmul.f32 %v429_v31, %v421_v30  ;;  %v1610_v30 = vrot.slane %v1162_v19, %v1515_v50  ;;  %v1613_v31 = vrot.slane %v1162_v19, %v1517_v51 }
  0xca   : > { %v445_v35 = vmul.f32 %v443_v34, %v431_v33 }
  0xcc   : > { %v459_v37 = vadd.f32 %v457_v36, %v445_v35 }
  0xce   : > { %vm460_vm1 = vcmp.ge.f32.partialorder %v459_v37, 0.0  ;;  %v461_v38 = vmul.f32 0.2, %v459_v37 }
  0xd0   : > { %v1468_v39 = vsel %vm460_vm1, %v459_v37, %v461_v38  ;;  %v1164_v37 = vld [vmem:[%s1843_s10 + $0x10] sm:$0x3] }
  0xd1   : > { %533 = vrot.lane.b32.xlu1 %v1468_v39, %s1851_s25  ;;  %489 = vrot.lane.b32.xlu0 %v1468_v39, %s1325_s29  ;;  %v1476_v40 = vcombine.high %v1468_v39, %v1468_v39 }
  0xd5   : > { %466 = vrot.lane.b32.xlu1 %v1468_v39, %s1326_s30  ;;  %513 = vrot.lane.b32.xlu0 %v1476_v40, %s1855_s12 }
  0xd9   : > { %511 = vrot.lane.b32.xlu1 %v1468_v39, %s1855_s12  ;;  %557 = vrot.lane.b32.xlu0 %v1476_v40, %s1853_s13 }
  0xdd   : > { %555 = vrot.lane.b32.xlu1 %v1468_v39, %s1853_s13  ;;  %601 = vrot.lane.b32.xlu0 %v1476_v40, %s1849_s14 }
  0xe1   : > { %599 = vrot.lane.b32.xlu1 %v1468_v39, %s1849_s14  ;;  %579 = vrot.lane.b32.xlu0 %v1476_v40, %s1845_s15  ;;  %s1864_s14 = smov 112  }
  0xe5   : > { %623 = vrot.lane.b32.xlu0 %v1476_v40, %s1847_s16  ;;  %491 = vrot.lane.b32.xlu1 %v1476_v40, %s1325_s29 }
  0xe9   : > { %535 = vrot.lane.b32.xlu1 %v1476_v40, %s1851_s25  ;;  %s1863_s25 = smov 1  }
  0xed   : > { %468 = vrot.lane.b32.xlu1 %v1476_v40, %s1326_s30 }
  0xf1   : > { %577 = vrot.lane.b32.xlu1 %v1468_v39, %s1845_s15  ;;  %s1865_s15 = smov 113  }
  0xf5   : > { %621 = vrot.lane.b32.xlu1 %v1468_v39, %s1847_s16  ;;  %s1866_s16 = smov 111  }
  0xf9   : > { %679 = vperm.xlu1 %1251, %v676_v42  }
 0x143   : > { %v534_v43 = vpop.permute.xlu1 %533  ;;  %v490_v45 = vpop.permute.xlu0 %489 }
 0x147   : > { %v1511_v44 = vpop.permute.xlu1 %466  ;;  %v514_v47 = vpop.permute.xlu0 %513 }
 0x14b   : > { %v512_v46 = vpop.permute.xlu1 %511  ;;  %v558_v56 = vpop.permute.xlu0 %557 }
 0x14c   : > { %v516_v13 = vsel %vm515_vm2, %v512_v46, %v514_v47  ;;  %v517_v14 = vsel %vm515_vm2, %v514_v47, %v512_v46 }
 0x14d   : > { %v531_v32 = vmul.f32 %v1533_v58, %v517_v14  ;;  %v532_v33 = vmul.f32 %v1536_v59, %v516_v13 }
 0x14f   : > { %v556_v48 = vpop.permute.xlu1 %555  ;;  %v602_v17 = vpop.permute.xlu0 %601 }
 0x150   : > { %v560_v15 = vsel %vm559_vm3, %v556_v48, %v558_v56  ;;  %v561_v16 = vsel %vm559_vm3, %v558_v56, %v556_v48  ;;  %v1632_v56 = vrot.slane %v1164_v37, %v1517_v51 }
 0x151   : > { %v575_v28 = vmul.f32 %v1540_v60, %v560_v15  ;;  %v576_v29 = vmul.f32 %v1549_v63, %v561_v16 }
 0x153   : > { %v600_v54 = vpop.permute.xlu1 %599  ;;  %v580_v46 = vpop.permute.xlu0 %579  ;;  %v658_v55 = vrot.slane %v576_v29, 4  ;;  %v675_v29 = vld [vmem:[%s1836_s3] sm:$0xf] }
 0x154   : > { %v604_v20 = vsel %vm603_vm4, %v600_v54, %v602_v17  ;;  %v605_v21 = vsel %vm603_vm4, %v602_v17, %v600_v54  ;;  %v657_v54 = vrot.slane %v575_v28, 4 }
 0x155   : > { %v619_v38 = vmul.f32 %v1553_v0, %v604_v20  ;;  %v620_v42 = vmul.f32 %v1557_v2, %v605_v21  ;;  %v672_v20 = vsel %vm389_vm0, %v1476_v40, %v658_v55 }
 0x157   : > { %v492_v1 = vpop.permute.xlu1 %491  ;;  %v663_v15 = vrot.slane %v619_v38, 4  ;;  %v664_v51 = vrot.slane %v620_v42, 4 }
 0x158   : > { %v494_v10 = vsel %vm493_vm5, %v490_v45, %v492_v1  ;;  %v495_v11 = vsel %vm493_vm5, %v492_v1, %v490_v45 }
 0x159   : > { %v509_v24 = vmul.f32 %v1560_v5, %v495_v11  ;;  %v510_v25 = vmul.f32 %v1563_v6, %v494_v10 }
 0x15b   : > { %v536_v18 = vpop.permute.xlu1 %535  ;;  %v645_v47 = vrot.slane %v509_v24, 4  ;;  %v646_v48 = vrot.slane %v510_v25, 4 }
 0x15c   : > { %v538_v22 = vsel %vm537_vm6, %v534_v43, %v536_v18  ;;  %v539_v23 = vsel %vm537_vm6, %v536_v18, %v534_v43  ;;  %v624_v18 = vpop.permute.xlu0 %623 }
 0x15d   : > { %v553_v26 = vmul.f32 %v1567_v7, %v539_v23  ;;  %v554_v27 = vmul.f32 %v1570_v8, %v538_v22  ;;  %v671_v22 = vsel %vm389_vm0, %v1468_v39, %v657_v54 }
 0x15f   : > { %v651_v34 = vrot.slane %v553_v26, 4  ;;  %v652_v35 = vrot.slane %v554_v27, 4  ;;  %v469_v36 = vpop.permute.xlu1 %468  ;;  %v1653_v27 = vrot.slane %v1164_v37, %v1515_v50 }
 0x160   : > { %v473_v43 = vsel %vm472_vm7, %v1511_v44, %v469_v36  ;;  %v474_v45 = vsel %vm472_vm7, %v469_v36, %v1511_v44 }
 0x161   : > { %v487_v52 = vmul.f32 %v1574_v9, %v474_v45  ;;  %v488_v53 = vmul.f32 %v1581_v12, %v473_v43  ;;  %v670_v62 = vsel %vm389_vm0, %v532_v33, %v652_v35  ;;  %v669_v1 = vsel %vm389_vm0, %v531_v32, %v651_v34 }
 0x163   : > { %v578_v57 = vpop.permute.xlu1 %577  ;;  %v668_v61 = vsel %vm389_vm0, %v488_v53, %v646_v48  ;;  %v667_v44 = vsel %vm389_vm0, %v487_v52, %v645_v47  ;;  %v794_v48 = vld [vmem:[%s1839_s6] sm:$0xf] }
 0x164   : > { %v582_v10 = vsel %vm581_vm8, %v578_v57, %v580_v46  ;;  %v583_v11 = vsel %vm581_vm8, %v580_v46, %v578_v57  ;;  %v1181_v13 = vpack.c.bf16 %v670_v62, %v668_v61  ;;  %v1183_v14 = vpack.c.bf16 %v669_v1, %v667_v44  ;;  %v786_v52 = vld [vmem:[%s1838_s5] sm:$0xf] }
 0x165   : > { %v597_v16 = vmul.f32 %v1610_v30, %v582_v10  ;;  %v598_v17 = vmul.f32 %v1613_v31, %v583_v11 }
 0x166   : > { %1182 = vmatprep.subr.bf16.mxu0 %v1181_v13 }
 0x167   : > { %1184 = vmatpush1.bf16.msra.mxu0 %v1183_v14  ;;  %v622_v19 = vpop.permute.xlu1 %621  ;;  %v674_v21 = vsel %vm389_vm0, %v598_v17, %v664_v51  ;;  %v673_v23 = vsel %vm389_vm0, %v597_v16, %v663_v15 }
 0x168   : > { %v627_v24 = vsel %vm625_vm9, %v624_v18, %v622_v19  ;;  %v1185_v25 = vpack.c.bf16 %v674_v21, %v672_v20  ;;  %v1187_v26 = vpack.c.bf16 %v673_v23, %v671_v22  ;;  %v626_v40 = vsel %vm625_vm9, %v622_v19, %v624_v18 }
 0x169   : > { %v642_v28 = vmul.f32 %v1632_v56, %v627_v24  ;;  %v641_v39 = vmul.f32 %v1653_v27, %v626_v40 }
 0x16a   : > { %1186 = vmatprep.subr.bf16.mxu0 %v1185_v25  ;;  %v905_v25 = vld [vmem:[%s1841_s8] sm:$0xff] }
 0x16b   : > { %1188 = vmatpush1.bf16.msra.mxu0 %v1187_v26 }
 0x16c   : > { %1165 = vmatprep.subr.msk.mxu0 %vm389_vm0, %v642_v28 }
 0x16f   : > { %1166 = vmatpush1.msk.msra.mxu0 %vm389_vm0, %v641_v39 }
 0x170   : > { %1167 = vmatmul.mubr.msk.f32.vlgmr.msra.gmra.mrb[0].mxu0 %vm682_vm10, %v675_v29 }
 0x178   : > { %v680_v50 = vpop.permute.xlu1 %679 }
 0x243   : > { %v758_v32 = vpop.f32.mrb[0].mxu0 }
 0x244   : > { %v759_v33 = vadd.f32 %v758_v32, %v680_v50  ;;  %v760_v34 = vpop.f32.mrb[1].mxu0 }
 0x245   : > { %v761_v35 = vadd.f32 %v760_v34, %v680_v50 }
 0x246   : > { %v763_v36 = vsel %vm389_vm0, %v759_v33, 0.0  ;;  %v769_v37 = vmul.f32 %v759_v33, %v759_v33 }
 0x247   : > { %v764_v38 = vsel %vm389_vm0, %v761_v35, 0.0  ;;  %v770_v42 = vmul.f32 %v761_v35, %v761_v35 }
 0x248   : > { %v765_v43 = vadd.f32 %v764_v38, %v763_v36  ;;  %v771_v45 = vsel %vm389_vm0, %v769_v37, 0.0 }
 0x249   : > { %v772_v46 = vsel %vm389_vm0, %v770_v42, 0.0 }
 0x24a   : > { %766 = vadd.xlane.f32.xlu0 %v765_v43  ;;  %v773_v47 = vadd.f32 %v772_v46, %v771_v45 }
 0x24c   : > { %774 = vadd.xlane.f32.xlu1 %v773_v47 }
 0x25d   : > { %797 = vperm.xlu1 %1251, %v794_v48  }
 0x260   : > { %789 = vperm.xlu0 %1252, %v786_v52  }
 0x2d7   : > { %v767_v53 = vpop.xlane.xlu0 %766 }
 0x2d8   : > { %v768_v54 = vmul.f32 0.00390625, %v767_v53 }
 0x2d9   : > { %v775_v55 = vpop.xlane.xlu1 %774 }
 0x2da   : > { %v776_v57 = vmul.f32 0.00390625, %v775_v55  ;;  %v777_v61 = vmul.f32 %v768_v54, %v768_v54  ;;  %v782_v10 = vsub.f32 %v759_v33, %v768_v54  ;;  %v783_v11 = vsub.f32 %v761_v35, %v768_v54 }
 0x2dc   : > { %v778_v62 = vsub.f32 %v776_v57, %v777_v61 }
 0x2dd   : > { %v798_v18 = vpop.permute.xlu1 %797 }
 0x2de   : > { %v779_v44 = vmax.f32 %v778_v62, 0.0 }
 0x2df   : > { %v790_v14 = vpop.permute.xlu0 %789 }
 0x2e0   : > { %v780_v1 = vadd.f32 1e-05, %v779_v44 }
 0x2e2   : > { %1256 = vrsqrt.f32 %v780_v1 }
 0x2ec   : > { %v1257_v13 = vpop.eup %1256 }
 0x2ed   : > { %v784_v15 = vmul.f32 %v1257_v13, %v782_v10  ;;  %v785_v51 = vmul.f32 %v1257_v13, %v783_v11 }
 0x2ef   : > { %v792_v16 = vmul.f32 %v790_v14, %v784_v15  ;;  %v793_v17 = vmul.f32 %v790_v14, %v785_v51 }
 0x2f1   : > { %v800_v19 = vadd.f32 %v798_v18, %v792_v16  ;;  %v801_v20 = vadd.f32 %v798_v18, %v793_v17 }
 0x2f3   : > { %vm802_vm11 = vcmp.ge.f32.partialorder %v800_v19, 0.0  ;;  %vm803_vm12 = vcmp.ge.f32.partialorder %v801_v20, 0.0  ;;  %v804_v21 = vmul.f32 0.2, %v800_v19  ;;  %v805_v22 = vmul.f32 0.2, %v801_v20 }
 0x2f5   : > { %v1675_v23 = vsel %vm802_vm11, %v800_v19, %v804_v21  ;;  %v1677_v24 = vsel %vm803_vm12, %v801_v20, %v805_v22 }
 0x2f6   : > { %810 = vrot.lane.b32.xlu0 %v1677_v24, %s1326_s30  ;;  %816 = vrot.lane.b32.xlu1 %v1675_v23, %s1325_s29 }
 0x2fa   : > { %826 = vrot.lane.b32.xlu0 %v1677_v24, %s1861_s22  ;;  %818 = vrot.lane.b32.xlu1 %v1677_v24, %s1325_s29 }
 0x2fe   : > { %842 = vrot.lane.b32.xlu0 %v1677_v24, %s1862_s24  ;;  %832 = vrot.lane.b32.xlu1 %v1675_v23, %s1863_s25 }
 0x302   : > { %858 = vrot.lane.b32.xlu0 %v1677_v24, %s1864_s14  ;;  %834 = vrot.lane.b32.xlu1 %v1677_v24, %s1863_s25  ;;  %s377_s25 = sand.u32 1, %s1312_s18  }
 0x306   : > { %850 = vrot.lane.b32.xlu0 %v1677_v24, %s1865_s15  ;;  %808 = vrot.lane.b32.xlu1 %v1675_v23, %s1326_s30 }
 0x30a   : > { %866 = vrot.lane.b32.xlu0 %v1677_v24, %s1866_s16  ;;  %824 = vrot.lane.b32.xlu1 %v1675_v23, %s1861_s22  ;;  %s1078_s22 = scalar_lea.sflag [#allocation3], %s377_s25 }
 0x30e   : > { %840 = vrot.lane.b32.xlu1 %v1675_v23, %s1862_s24 }
 0x312   : > { %856 = vrot.lane.b32.xlu1 %v1675_v23, %s1864_s14  ;;  %s1155_s14 = sshll.u32 %s377_s25, 4 }
 0x316   : > { %848 = vrot.lane.b32.xlu1 %v1675_v23, %s1865_s15  ;;  %s1180_s15 = sshll.u32 %s1415_s21, 8  ;;  %s1333_s21 = smov [#allocation2]  }
 0x317   : > { %s1791_s13 = scalar_lea.hbm %s1844_s11, %s1180_s15 }
 0x31a   : > { %864 = vrot.lane.b32.xlu1 %v1675_v23, %s1866_s16  ;;  %s379_s16 = scalar_lea.vmem [#allocation2], %s1155_s14  ;;  %s1262_s14 = sshll.u32 %s1333_s21, 4  ;;  %s1263_s14 = int_to_ptr.vmem [resolvable:$false] %s1262_s14 }
 0x31b   : > { %s1092_s29 = sshll.u32 %s379_s16, 4  ;;  %s1264_s0 = scalar_lea.vmem %s1263_s14, 512  ;;  %s1793_s29 = int_to_ptr.vmem [resolvable:$true] %s1092_s29 }
 0x31c   : > { %s1258_s24 = scalar_lea.vmem %s1793_s29, 256  ;;  %p1265_p0 = scmp.lt.s32.totalorder %s1793_s29, %s1263_s14 }
 0x31d   : > { %p1259_p11 = scmp.ne.s32.totalorder %s1793_s29, %s1258_s24  ;;  %p1266_p1 = scmp.lt.s32.totalorder %s1264_s0, %s1258_s24 }
 0x31e   : > { %908 = vperm.xlu1 %1251, %v905_v25  }
 0x31f   : > { %p1260_p12 = pnand %p1259_p11, %p1432_p5  ;;  %p1267_p2 = por %p1266_p1, %p1265_p0 }
 0x321   : > { %p1261_p13 = pneg %p1260_p12 }
 0x323   : > { %p1268_p3 = pnand %p1267_p2, %p1261_p13 }
 0x368   : > { %v817_v26 = vpop.permute.xlu1 %816  ;;  %v811_v40 = vpop.permute.xlu0 %810 }
 0x36c   : > { %v819_v28 = vpop.permute.xlu1 %818  ;;  %v827_v29 = vpop.permute.xlu0 %826 }
 0x36d   : > { %v820_v32 = vsel %vm493_vm5, %v817_v26, %v819_v28  ;;  %v821_v33 = vsel %vm493_vm5, %v819_v28, %v817_v26 }
 0x36e   : > { %v822_v37 = vmul.f32 %v821_v33, %v1560_v5  ;;  %v823_v38 = vmul.f32 %v820_v32, %v1563_v6 }
 0x370   : > { %v833_v39 = vpop.permute.xlu1 %832  ;;  %v843_v45 = vpop.permute.xlu0 %842  ;;  %v874_v54 = vrot.slane %v822_v37, 4  ;;  %v875_v5 = vrot.slane %v823_v38, 4 }
 0x374   : > { %v835_v50 = vpop.permute.xlu1 %834 }
 0x375   : > { %v836_v34 = vsel %vm537_vm6, %v833_v39, %v835_v50  ;;  %v837_v35 = vsel %vm537_vm6, %v835_v50, %v833_v39 }
 0x376   : > { %v838_v46 = vmul.f32 %v837_v35, %v1567_v7  ;;  %v839_v47 = vmul.f32 %v836_v34, %v1570_v8  ;;  %v859_v8 = vpop.permute.xlu0 %858 }
 0x378   : > { %v809_v36 = vpop.permute.xlu1 %808  ;;  %v880_v57 = vrot.slane %v838_v46, 4  ;;  %v881_v61 = vrot.slane %v839_v47, 4 }
 0x379   : > { %v812_v42 = vsel %vm472_vm7, %v809_v36, %v811_v40  ;;  %v813_v43 = vsel %vm472_vm7, %v811_v40, %v809_v36 }
 0x37a   : > { %v814_v48 = vmul.f32 %v813_v43, %v1574_v9  ;;  %v815_v52 = vmul.f32 %v812_v42, %v1581_v12  ;;  %v851_v18 = vpop.permute.xlu0 %850 }
 0x37c   : > { %v825_v53 = vpop.permute.xlu1 %824  ;;  %v897_v9 = vsel %vm389_vm0, %v815_v52, %v875_v5  ;;  %v896_v1 = vsel %vm389_vm0, %v814_v48, %v874_v54 }
 0x37d   : > { %v828_v6 = vsel %vm515_vm2, %v825_v53, %v827_v29  ;;  %v829_v55 = vsel %vm515_vm2, %v827_v29, %v825_v53 }
 0x37e   : > { %v830_v62 = vmul.f32 %v829_v55, %v1533_v58  ;;  %v831_v7 = vmul.f32 %v828_v6, %v1536_v59  ;;  %v867_v29 = vpop.permute.xlu0 %866 }
 0x380   : > { %v841_v44 = vpop.permute.xlu1 %840  ;;  %v899_v12 = vsel %vm389_vm0, %v831_v7, %v881_v61  ;;  %v898_v10 = vsel %vm389_vm0, %v830_v62, %v880_v57 }
 0x381   : > { %v844_v11 = vsel %vm559_vm3, %v841_v44, %v843_v45  ;;  %v845_v13 = vsel %vm559_vm3, %v843_v45, %v841_v44  ;;  %v1189_v14 = vpack.c.bf16 %v899_v12, %v897_v9  ;;  %v1191_v58 = vpack.c.bf16 %v898_v10, %v896_v1 }
 0x382   : > { %v846_v59 = vmul.f32 %v844_v11, %v1540_v60  ;;  %v847_v15 = vmul.f32 %v845_v13, %v1549_v63 }
 0x383   : > { %1190 = vmatprep.subr.bf16.mxu1 %v1189_v14 }
 0x384   : > { %1192 = vmatpush1.bf16.msra.mxu1 %v1191_v58  ;;  %v857_v51 = vpop.permute.xlu1 %856  ;;  %v886_v21 = vrot.slane %v846_v59, 4  ;;  %v887_v22 = vrot.slane %v847_v15, 4 }
 0x385   : > { %v860_v16 = vsel %vm603_vm4, %v857_v51, %v859_v8  ;;  %v861_v17 = vsel %vm603_vm4, %v859_v8, %v857_v51 }
 0x386   : > { %v862_v19 = vmul.f32 %v860_v16, %v1553_v0  ;;  %v863_v20 = vmul.f32 %v861_v17, %v1557_v2  ;;  %v901_v0 = vsel %vm389_vm0, %v1677_v24, %v887_v22  ;;  %v900_v32 = vsel %vm389_vm0, %v1675_v23, %v886_v21  ;;  %v904_v23 = vld [vmem:[%s1840_s7] sm:$0xff] }
 0x388   : > { %v849_v25 = vpop.permute.xlu1 %848  ;;  %v892_v26 = vrot.slane %v862_v19, 4  ;;  %v893_v28 = vrot.slane %v863_v20, 4 }
 0x389   : > { %v852_v60 = vsel %vm581_vm8, %v849_v25, %v851_v18  ;;  %v853_v63 = vsel %vm581_vm8, %v851_v18, %v849_v25 }
 0x38a   : > { %v854_v40 = vmul.f32 %v852_v60, %v1610_v30  ;;  %v855_v39 = vmul.f32 %v853_v63, %v1613_v31 }
 0x38c   : > { %v865_v50 = vpop.permute.xlu1 %864  ;;  %v903_v2 = vsel %vm389_vm0, %v855_v39, %v893_v28  ;;  %v902_v33 = vsel %vm389_vm0, %v854_v40, %v892_v26 }
 0x38d   : > { %v869_v34 = vsel %vm625_vm9, %v867_v29, %v865_v50  ;;  %v1193_v35 = vpack.c.bf16 %v903_v2, %v901_v0  ;;  %v1195_v36 = vpack.c.bf16 %v902_v33, %v900_v32  ;;  %v868_v31 = vsel %vm625_vm9, %v865_v50, %v867_v29 }
 0x38e   : > { %v871_v30 = vmul.f32 %v869_v34, %v1632_v56  ;;  %v870_v24 = vmul.f32 %v868_v31, %v1653_v27 }
 0x38f   : > { %1194 = vmatprep.subr.bf16.mxu1 %v1193_v35 }
 0x390   : > { %1196 = vmatpush1.bf16.msra.mxu1 %v1195_v36 }
 0x391   : > { %1168 = vmatprep.subr.msk.mxu1 %vm389_vm0, %v871_v30 }
 0x394   : > { %1169 = vmatpush1.msk.msra.mxu1 %vm389_vm0, %v870_v24 }
 0x395   : > { %1170 = vmatmul.mubr.msk.f32.vlgmr.msra.gmra.mrb[0].mxu1 %vm682_vm10, %v904_v23  ;;  %1171 = vmatprep.subr.msk.mxu1 %vm389_vm0, %v1457_v4 }
 0x396   : > { %1172 = vmatpush1.msk.msra.mxu1 %vm389_vm0, %v1453_v3  ;;  %1064 = vmatprep.mubr.f32.mxu1 %v1332_v41 }
 0x39d   : > { %1173 = vmatmul.mubr.msk.f32.vlgmr.msra.gmra.mrb[0].mxu1 %vm992_vm13, %v991_v49  ;;  %v909_v56 = vpop.permute.xlu1 %908 }
 0x470   : > { %v1066_v27 = vpop.f32.mrb[0].mxu1 }
 0x471   : > { %v1197_v37 = vadd.f32 %v1066_v27, %v909_v56  ;;  %v1068_v38 = vpop.f32.mrb[1].mxu1 }
 0x472   : > { %v1198_v4 = vadd.f32 %v1068_v38, %v909_v56 }
 0x473   : > { %v1073_v3 = vmul.f32 0.70710677, %v1197_v37 }
 0x474   : > { %v1074_v42 = vmul.f32 0.70710677, %v1198_v4 }
 0x475   : > { %1075 = vst [vmem:[%s379_s16] sm:$0xff] %v1073_v3 }
 0x476   : > { %1076 = vst [vmem:[%s379_s16 + $0x8] sm:$0xff] %v1074_v42 }
 0x477   : > { %1271 = shalt.err (!%p1268_p3)
}
 0x478   : > { %s1272_s25 = scalar_lea.hbm %s1791_s13, 256  ;;  %s1276_s30 = scalar_lea.hbm %s1844_s11, 512 }
 0x479   : > { %p1273_p4 = scmp.ne.s32.totalorder %s1791_s13, %s1272_s25  ;;  %p1277_p9 = scmp.lt.u32.totalorder %s1791_s13, %s1844_s11 }
 0x47a   : > { %p1278_p10 = scmp.lt.u32.totalorder %s1276_s30, %s1272_s25  ;;  %p1280_p12 = scmp.lt.u32.totalorder %s1272_s25, %s1791_s13 }
 0x47b   : > { %p1274_p7 = pnand %p1273_p4, %p1432_p5 }
 0x47c   : > { %p1279_p11 = por %p1278_p10, %p1277_p9 }
 0x47d   : > { %p1275_p8 = pneg %p1274_p7 }
 0x47e   : > { %p1281_p13 = por %p1280_p12, %p1279_p11 }
 0x480   : > { %p1282_p0 = pnand %p1281_p13, %p1275_p8 }
 0x482   : > { %1285 = shalt.err (!%p1282_p0)
}
 0x483   : > { %1201 = dma.vmem_to_hbm [thread:$0]  (%p1432_p5), %s1793_s29, 256, %s1791_s13, %s1078_s22  }
 0x484 PF: > { %p1207_p1 = scmp.ge.s32.totalorder %s1320_s20, 2  ;;  %s1104_s0 = sand.u32 1, %s1308_s17  }
 0x485   : > { %s1105_s24 = scalar_lea.sflag [#allocation3], %s1104_s0 }
 0x486   : > { %p1204_p2 = pnand %p1207_p1, %p1436_p6 }
 0x488   : > { %1303 = dma.done.wait (!%p1204_p2), %s1105_s24, 256  }
 0x489   : > { %1305 = vsyncadd (!%p1204_p2), %s1105_s24, 4294967040  ;;  %p21_p3 = scmp.ge.s32.totalorder %s1419_s23, 4   ;;  %s1867_s17 = smov %s1312_s18 }
 0x48a   : > { %s1868_s18 = smov %s1316_s19  ;;  %s1869_s19 = smov %s1430_s26 }
 0x48b   : > { %s1870_s20 = smov %s1419_s23  ;;  %23 = sbr.rel (!%p21_p3) target bundleno = 5 (0x5), region = 106 }
 0x492   :  { %1110 = vsyncpa [#allocation3], 1 }
 0x493   :  { %1112 = vsyncpa [#allocation3 + $0x1], 1 }

</bundles_post_ra>
